<compile_context>
chip_gen: v6e
topology: v6e:2x2x1
jax: 0.10.0
libtpu: 0.0.40
codegen_flags: <defaults>
</compile_context>

<pallas_src>
import jax
import jax.numpy as jnp
from jax.experimental import pallas as pl
from jax.experimental.pallas import tpu as pltpu

# PyTorch layer widths: n_feature -> 128 -> 96 -> 64 -> 48 -> 32 -> 16 -> 8 -> 2
HIDDEN_SIZES = [128, 96, 64, 48, 32, 16, 8, 2]
LANE = 128
LAST_OUT_PAD = 8          # final layer padded only to 8 lanes (16x less writeback)


def _round_up(n, m):
    return ((n + m - 1) // m) * m


def _cdiv(a, b):
    return (a + b - 1) // b


def _choose_tile(B, batch_tile):
    """Rows per grid step.

    - tiny batches (<32): one step, rounded to 16 for bf16 sublane packing
    - otherwise: an even number of steps (>=2) so v7x megacore can shard,
      and the per-step tile is sized to minimize pad waste in the last block.
    """
    if B < 32:
        return _round_up(max(B, 16), 16)
    n_steps = 2 * _cdiv(B, 2 * batch_tile)      # even, >= 2
    return _round_up(_cdiv(B, n_steps), 16)


def mlp_kernel(x_ref, w0_ref, wmid_ref, wlast_ref, bmid_ref, blast_ref, o_ref):
    """All 8 linears + ReLUs fused; bf16 on the MXU, f32 accumulation."""
    # Cast f32 -> bf16 on the VPU inside the kernel (no extra HBM round trip).
    h = x_ref[...].astype(jnp.bfloat16)                     # [tile, n_feature]

    # Layer 0: n_feature -> 128 (padded)
    acc = jnp.dot(h, w0_ref[...], preferred_element_type=jnp.float32)
    acc = acc + bmid_ref[0:1, :]
    acc = jnp.maximum(acc, 0.0)                             # ReLU in f32
    h = acc.astype(jnp.bfloat16)

    # Layers 1..6: 128 -> 128 (padded), weights stacked in one (6,128,128) ref
    n_mid = wmid_ref.shape[0]
    for i in range(n_mid):                                  # static unroll
        acc = jnp.dot(h, wmid_ref[i], preferred_element_type=jnp.float32)
        acc = acc + bmid_ref[i + 1:i + 2, :]
        acc = jnp.maximum(acc, 0.0)
        h = acc.astype(jnp.bfloat16)

    # Final `out` layer: 128 (padded) -> 8 (padded), no ReLU. Narrow writeback.
    o_ref[...] = (jnp.dot(h, wlast_ref[...], preferred_element_type=jnp.float32)
                  + blast_ref[...])


def mlp_forward(x, packed, *, batch_tile=1024, out_dim=HIDDEN_SIZES[-1]):
    """x: [B, n_feature] f32.  packed: output of prepare_params."""
    w0, w_mid, w_last, b_mid, b_last = packed
    B, n_feature = x.shape
    out_pad = w_last.shape[1]                               # 8

    eff_tile = _choose_tile(B, batch_tile)
    grid = _cdiv(B, eff_tile)                               # no jnp.pad: last block
                                                            # clips its writeback
    n_mid = w_mid.shape[0]
    flops = 2 * B * (n_feature * LANE + n_mid * LANE * LANE + LANE * out_pad)
    bytes_accessed = (B * n_feature * 4 + B * out_pad * 4 +
                      (w0.size + w_mid.size + w_last.size) * 2 +
                      (b_mid.size + b_last.size) * 4)

    out = pl.pallas_call(
        mlp_kernel,
        out_shape=jax.ShapeDtypeStruct((B, out_pad), jnp.float32),
        grid_spec=pltpu.PrefetchScalarGridSpec(
            num_scalar_prefetch=0,
            grid=(grid,),
            in_specs=[
                pl.BlockSpec((eff_tile, n_feature), lambda i: (i, 0)),   # x (f32)
                pl.BlockSpec(w0.shape, lambda i: (0, 0)),                # pinned
                pl.BlockSpec(w_mid.shape, lambda i: (0, 0, 0)),          # pinned
                pl.BlockSpec(w_last.shape, lambda i: (0, 0)),            # pinned
                pl.BlockSpec(b_mid.shape, lambda i: (0, 0)),             # pinned
                pl.BlockSpec(b_last.shape, lambda i: (0, 0)),            # pinned
            ],
            out_specs=pl.BlockSpec((eff_tile, out_pad), lambda i: (i, 0)),
        ),
        compiler_params=pltpu.CompilerParams(
            dimension_semantics=("parallel",),              # shard steps across TCs
            vmem_limit_bytes=32 * 1024 * 1024,
        ),
        cost_estimate=pl.CostEstimate(
            flops=flops, transcendentals=0, bytes_accessed=bytes_accessed),
    )(x, w0, w_mid, w_last, b_mid, b_last)
    return out[:, :out_dim]


def init_params(key, n_feature):
    """PyTorch-matching shapes/init; W stored [in, out], b stored [1, out], f32."""
    params = []
    dims = [n_feature] + HIDDEN_SIZES
    for fan_in, fan_out in zip(dims[:-1], dims[1:]):
        key, wk, bk = jax.random.split(key, 3)
        bound = 1.0 / jnp.sqrt(jnp.float32(fan_in))         # PyTorch default uniform bound
        w = jax.random.uniform(wk, (fan_in, fan_out), jnp.float32, -bound, bound)
        b = jax.random.uniform(bk, (1, fan_out), jnp.float32, -bound, bound)
        params += [w, b]
    return params


def prepare_params(params, lane=LANE, last_out_pad=LAST_OUT_PAD):
    """Zero-pad hidden layer widths to 128 lanes (final layer only to 8), cast
    weights to bf16 (biases stay f32), and pack:
      w0     [n_feature, 128] bf16
      w_mid  [6, 128, 128]    bf16   (hidden2..hidden7, padded)
      w_last [128, 8]         bf16   (out layer, padded)
      b_mid  [7, 128]         f32    (biases of layers 0..6)
      b_last [1, 8]           f32
    Padding is mathematically exact: padded inputs hit zero weight rows, padded
    outputs get zero columns + zero bias, and ReLU(0)=0 propagates the zeros."""
    n_layers = len(params) // 2
    ws, bs = [], []
    prev_out_pad = None
    for i in range(n_layers):
        w, b = params[2 * i], params[2 * i + 1]
        fan_in, fan_out = w.shape
        in_pad = fan_in if i == 0 else prev_out_pad
        out_pad = last_out_pad if i == n_layers - 1 else lane
        w_p = jnp.zeros((in_pad, out_pad), jnp.float32).at[:fan_in, :fan_out].set(w)
        b_p = jnp.zeros((out_pad,), jnp.float32).at[:fan_out].set(b.reshape(-1))
        ws.append(w_p.astype(jnp.bfloat16))
        bs.append(b_p)
        prev_out_pad = out_pad
    w0 = ws[0]
    w_mid = jnp.stack(ws[1:-1], axis=0)
    w_last = ws[-1]
    b_mid = jnp.stack(bs[:-1], axis=0)
    b_last = bs[-1].reshape(1, last_out_pad)
    return w0, w_mid, w_last, b_mid, b_last


def mlp_reference(x, packed, out_dim=HIDDEN_SIZES[-1]):
    """Pure-JAX reference using the same bf16-matmul / f32-accumulate recipe."""
    w0, w_mid, w_last, b_mid, b_last = packed
    h = x.astype(jnp.bfloat16)
    acc = jnp.dot(h, w0, preferred_element_type=jnp.float32) + b_mid[0]
    acc = jnp.maximum(acc, 0.0)
    h = acc.astype(jnp.bfloat16)
    for i in range(w_mid.shape[0]):
        acc = jnp.dot(h, w_mid[i], preferred_element_type=jnp.float32) + b_mid[i + 1]
        acc = jnp.maximum(acc, 0.0)
        h = acc.astype(jnp.bfloat16)
    acc = jnp.dot(h, w_last, preferred_element_type=jnp.float32) + b_last
    return acc[:, :out_dim]


if __name__ == "__main__":
    key = jax.random.PRNGKey(0)
    n_feature = 64

    key, pk = jax.random.split(key)
    params = init_params(pk, n_feature)
    packed = prepare_params(params)

    # Small batch: collapses to one grid step (tile=16).
    key, xk = jax.random.split(key)
    x_small = jax.random.normal(xk, (16, n_feature), jnp.float32)
    out_small = jax.block_until_ready(mlp_forward(x_small, packed))
    ref_small = mlp_reference(x_small, packed)
    assert out_small.shape == (16, 2), out_small.shape
    assert jnp.allclose(out_small, ref_small, atol=2e-2, rtol=2e-2), (
        float(jnp.max(jnp.abs(out_small - ref_small))))

    # Ragged multi-step batch: 100 rows -> tile=64, grid=(2,); the last block's
    # out-of-bounds tail rows are computed on garbage but never written back.
    key, xk2 = jax.random.split(key)
    x_rag = jax.random.normal(xk2, (100, n_feature), jnp.float32)
    out_rag = jax.block_until_ready(mlp_forward(x_rag, packed))
    ref_rag = mlp_reference(x_rag, packed)
    assert out_rag.shape == (100, 2), out_rag.shape
    assert jnp.allclose(out_rag, ref_rag, atol=2e-2, rtol=2e-2), (
        float(jnp.max(jnp.abs(out_rag - ref_rag))))

    print("KERNEL_OK")
</pallas_src>

<mosaic_0001>
module attributes {stable_mosaic.version = 11 : i64} {
  func.func @mlp_kernel(%arg0: i32, %arg1: memref<16x64xf32, #tpu.memory_space<vmem>>, %arg2: memref<64x128xbf16, #tpu.memory_space<vmem>>, %arg3: memref<6x128x128xbf16, #tpu.memory_space<vmem>>, %arg4: memref<128x8xbf16, #tpu.memory_space<vmem>>, %arg5: memref<7x128xf32, #tpu.memory_space<vmem>>, %arg6: memref<1x8xf32, #tpu.memory_space<vmem>>, %arg7: memref<16x8xf32, #tpu.memory_space<vmem>>) attributes {dimension_semantics = [#tpu.dimension_semantics<parallel>], iteration_bounds = array<i64: 1>, scalar_prefetch = 0 : i64, scratch_operands = 0 : i64, tpu.core_type = #tpu.core_type<tc>, window_params = [{transform_indices = @transform_0, window_bounds = array<i64: 16, 64>}, {pipeline_mode = #tpu.pipeline_mode<synchronous>, transform_indices = @transform_1, window_bounds = array<i64: 64, 128>}, {pipeline_mode = #tpu.pipeline_mode<synchronous>, transform_indices = @transform_2, window_bounds = array<i64: 6, 128, 128>}, {pipeline_mode = #tpu.pipeline_mode<synchronous>, transform_indices = @transform_3, window_bounds = array<i64: 128, 8>}, {pipeline_mode = #tpu.pipeline_mode<synchronous>, transform_indices = @transform_4, window_bounds = array<i64: 7, 128>}, {pipeline_mode = #tpu.pipeline_mode<synchronous>, transform_indices = @transform_5, window_bounds = array<i64: 1, 8>}, {transform_indices = @transform_6, window_bounds = array<i64: 16, 8>}]} {
    %c0 = arith.constant 0 : index
    %c0_0 = arith.constant 0 : index
    %0 = vector.load %arg1[%c0, %c0_0] : memref<16x64xf32, #tpu.memory_space<vmem>>, vector<16x64xf32>
    %1 = arith.truncf %0 : vector<16x64xf32> to vector<16x64xbf16>
    %c0_1 = arith.constant 0 : index
    %c0_2 = arith.constant 0 : index
    %2 = vector.load %arg2[%c0_1, %c0_2] : memref<64x128xbf16, #tpu.memory_space<vmem>>, vector<64x128xbf16>
    %cst = arith.constant dense<0.000000e+00> : vector<16x128xf32>
    %3 = tpu.matmul %1, %2, %cst {dimension_numbers = #tpu.dot_dimension_numbers<[1], [0], [0], [1], [0, 0, 1, 1], [], []>} : vector<16x64xbf16>, vector<64x128xbf16>, vector<16x128xf32> -> vector<16x128xf32>
    %c0_3 = arith.constant 0 : index
    %c0_4 = arith.constant 0 : index
    %4 = vector.load %arg5[%c0_3, %c0_4] : memref<7x128xf32, #tpu.memory_space<vmem>>, vector<1x128xf32>
    %5 = vector.broadcast %4 : vector<1x128xf32> to vector<16x128xf32>
    %6 = arith.addf %3, %5 : vector<16x128xf32>
    %cst_5 = arith.constant 0.000000e+00 : f32
    %7 = vector.broadcast %cst_5 : f32 to vector<16x128xf32>
    %8 = arith.maximumf %6, %7 : vector<16x128xf32>
    %9 = arith.truncf %8 : vector<16x128xf32> to vector<16x128xbf16>
    %c0_6 = arith.constant 0 : index
    %c0_7 = arith.constant 0 : index
    %c0_8 = arith.constant 0 : index
    %10 = vector.load %arg3[%c0_6, %c0_7, %c0_8] : memref<6x128x128xbf16, #tpu.memory_space<vmem>>, vector<1x128x128xbf16>
    %11 = vector.shape_cast %10 : vector<1x128x128xbf16> to vector<128x128xbf16>
    %cst_9 = arith.constant dense<0.000000e+00> : vector<16x128xf32>
    %12 = tpu.matmul %9, %11, %cst_9 {dimension_numbers = #tpu.dot_dimension_numbers<[1], [0], [0], [1], [0, 0, 1, 1], [], []>} : vector<16x128xbf16>, vector<128x128xbf16>, vector<16x128xf32> -> vector<16x128xf32>
    %c1 = arith.constant 1 : index
    %c0_10 = arith.constant 0 : index
    %13 = vector.load %arg5[%c1, %c0_10] : memref<7x128xf32, #tpu.memory_space<vmem>>, vector<1x128xf32>
    %14 = vector.broadcast %13 : vector<1x128xf32> to vector<16x128xf32>
    %15 = arith.addf %12, %14 : vector<16x128xf32>
    %cst_11 = arith.constant 0.000000e+00 : f32
    %16 = vector.broadcast %cst_11 : f32 to vector<16x128xf32>
    %17 = arith.maximumf %15, %16 : vector<16x128xf32>
    %18 = arith.truncf %17 : vector<16x128xf32> to vector<16x128xbf16>
    %c1_12 = arith.constant 1 : index
    %c0_13 = arith.constant 0 : index
    %c0_14 = arith.constant 0 : index
    %19 = vector.load %arg3[%c1_12, %c0_13, %c0_14] : memref<6x128x128xbf16, #tpu.memory_space<vmem>>, vector<1x128x128xbf16>
    %20 = vector.shape_cast %19 : vector<1x128x128xbf16> to vector<128x128xbf16>
    %cst_15 = arith.constant dense<0.000000e+00> : vector<16x128xf32>
    %21 = tpu.matmul %18, %20, %cst_15 {dimension_numbers = #tpu.dot_dimension_numbers<[1], [0], [0], [1], [0, 0, 1, 1], [], []>} : vector<16x128xbf16>, vector<128x128xbf16>, vector<16x128xf32> -> vector<16x128xf32>
    %c2 = arith.constant 2 : index
    %c0_16 = arith.constant 0 : index
    %22 = vector.load %arg5[%c2, %c0_16] : memref<7x128xf32, #tpu.memory_space<vmem>>, vector<1x128xf32>
    %23 = vector.broadcast %22 : vector<1x128xf32> to vector<16x128xf32>
    %24 = arith.addf %21, %23 : vector<16x128xf32>
    %cst_17 = arith.constant 0.000000e+00 : f32
    %25 = vector.broadcast %cst_17 : f32 to vector<16x128xf32>
    %26 = arith.maximumf %24, %25 : vector<16x128xf32>
    %27 = arith.truncf %26 : vector<16x128xf32> to vector<16x128xbf16>
    %c2_18 = arith.constant 2 : index
    %c0_19 = arith.constant 0 : index
    %c0_20 = arith.constant 0 : index
    %28 = vector.load %arg3[%c2_18, %c0_19, %c0_20] : memref<6x128x128xbf16, #tpu.memory_space<vmem>>, vector<1x128x128xbf16>
    %29 = vector.shape_cast %28 : vector<1x128x128xbf16> to vector<128x128xbf16>
    %cst_21 = arith.constant dense<0.000000e+00> : vector<16x128xf32>
    %30 = tpu.matmul %27, %29, %cst_21 {dimension_numbers = #tpu.dot_dimension_numbers<[1], [0], [0], [1], [0, 0, 1, 1], [], []>} : vector<16x128xbf16>, vector<128x128xbf16>, vector<16x128xf32> -> vector<16x128xf32>
    %c3 = arith.constant 3 : index
    %c0_22 = arith.constant 0 : index
    %31 = vector.load %arg5[%c3, %c0_22] : memref<7x128xf32, #tpu.memory_space<vmem>>, vector<1x128xf32>
    %32 = vector.broadcast %31 : vector<1x128xf32> to vector<16x128xf32>
    %33 = arith.addf %30, %32 : vector<16x128xf32>
    %cst_23 = arith.constant 0.000000e+00 : f32
    %34 = vector.broadcast %cst_23 : f32 to vector<16x128xf32>
    %35 = arith.maximumf %33, %34 : vector<16x128xf32>
    %36 = arith.truncf %35 : vector<16x128xf32> to vector<16x128xbf16>
    %c3_24 = arith.constant 3 : index
    %c0_25 = arith.constant 0 : index
    %c0_26 = arith.constant 0 : index
    %37 = vector.load %arg3[%c3_24, %c0_25, %c0_26] : memref<6x128x128xbf16, #tpu.memory_space<vmem>>, vector<1x128x128xbf16>
    %38 = vector.shape_cast %37 : vector<1x128x128xbf16> to vector<128x128xbf16>
    %cst_27 = arith.constant dense<0.000000e+00> : vector<16x128xf32>
    %39 = tpu.matmul %36, %38, %cst_27 {dimension_numbers = #tpu.dot_dimension_numbers<[1], [0], [0], [1], [0, 0, 1, 1], [], []>} : vector<16x128xbf16>, vector<128x128xbf16>, vector<16x128xf32> -> vector<16x128xf32>
    %c4 = arith.constant 4 : index
    %c0_28 = arith.constant 0 : index
    %40 = vector.load %arg5[%c4, %c0_28] : memref<7x128xf32, #tpu.memory_space<vmem>>, vector<1x128xf32>
    %41 = vector.broadcast %40 : vector<1x128xf32> to vector<16x128xf32>
    %42 = arith.addf %39, %41 : vector<16x128xf32>
    %cst_29 = arith.constant 0.000000e+00 : f32
    %43 = vector.broadcast %cst_29 : f32 to vector<16x128xf32>
    %44 = arith.maximumf %42, %43 : vector<16x128xf32>
    %45 = arith.truncf %44 : vector<16x128xf32> to vector<16x128xbf16>
    %c4_30 = arith.constant 4 : index
    %c0_31 = arith.constant 0 : index
    %c0_32 = arith.constant 0 : index
    %46 = vector.load %arg3[%c4_30, %c0_31, %c0_32] : memref<6x128x128xbf16, #tpu.memory_space<vmem>>, vector<1x128x128xbf16>
    %47 = vector.shape_cast %46 : vector<1x128x128xbf16> to vector<128x128xbf16>
    %cst_33 = arith.constant dense<0.000000e+00> : vector<16x128xf32>
    %48 = tpu.matmul %45, %47, %cst_33 {dimension_numbers = #tpu.dot_dimension_numbers<[1], [0], [0], [1], [0, 0, 1, 1], [], []>} : vector<16x128xbf16>, vector<128x128xbf16>, vector<16x128xf32> -> vector<16x128xf32>
    %c5 = arith.constant 5 : index
    %c0_34 = arith.constant 0 : index
    %49 = vector.load %arg5[%c5, %c0_34] : memref<7x128xf32, #tpu.memory_space<vmem>>, vector<1x128xf32>
    %50 = vector.broadcast %49 : vector<1x128xf32> to vector<16x128xf32>
    %51 = arith.addf %48, %50 : vector<16x128xf32>
    %cst_35 = arith.constant 0.000000e+00 : f32
    %52 = vector.broadcast %cst_35 : f32 to vector<16x128xf32>
    %53 = arith.maximumf %51, %52 : vector<16x128xf32>
    %54 = arith.truncf %53 : vector<16x128xf32> to vector<16x128xbf16>
    %c5_36 = arith.constant 5 : index
    %c0_37 = arith.constant 0 : index
    %c0_38 = arith.constant 0 : index
    %55 = vector.load %arg3[%c5_36, %c0_37, %c0_38] : memref<6x128x128xbf16, #tpu.memory_space<vmem>>, vector<1x128x128xbf16>
    %56 = vector.shape_cast %55 : vector<1x128x128xbf16> to vector<128x128xbf16>
    %cst_39 = arith.constant dense<0.000000e+00> : vector<16x128xf32>
    %57 = tpu.matmul %54, %56, %cst_39 {dimension_numbers = #tpu.dot_dimension_numbers<[1], [0], [0], [1], [0, 0, 1, 1], [], []>} : vector<16x128xbf16>, vector<128x128xbf16>, vector<16x128xf32> -> vector<16x128xf32>
    %c6 = arith.constant 6 : index
    %c0_40 = arith.constant 0 : index
    %58 = vector.load %arg5[%c6, %c0_40] : memref<7x128xf32, #tpu.memory_space<vmem>>, vector<1x128xf32>
    %59 = vector.broadcast %58 : vector<1x128xf32> to vector<16x128xf32>
    %60 = arith.addf %57, %59 : vector<16x128xf32>
    %cst_41 = arith.constant 0.000000e+00 : f32
    %61 = vector.broadcast %cst_41 : f32 to vector<16x128xf32>
    %62 = arith.maximumf %60, %61 : vector<16x128xf32>
    %63 = arith.truncf %62 : vector<16x128xf32> to vector<16x128xbf16>
    %c0_42 = arith.constant 0 : index
    %c0_43 = arith.constant 0 : index
    %64 = vector.load %arg4[%c0_42, %c0_43] : memref<128x8xbf16, #tpu.memory_space<vmem>>, vector<128x8xbf16>
    %cst_44 = arith.constant dense<0.000000e+00> : vector<16x8xf32>
    %65 = tpu.matmul %63, %64, %cst_44 {dimension_numbers = #tpu.dot_dimension_numbers<[1], [0], [0], [1], [0, 0, 1, 1], [], []>} : vector<16x128xbf16>, vector<128x8xbf16>, vector<16x8xf32> -> vector<16x8xf32>
    %c0_45 = arith.constant 0 : index
    %c0_46 = arith.constant 0 : index
    %66 = vector.load %arg6[%c0_45, %c0_46] : memref<1x8xf32, #tpu.memory_space<vmem>>, vector<1x8xf32>
    %67 = vector.broadcast %66 : vector<1x8xf32> to vector<16x8xf32>
    %68 = arith.addf %65, %67 : vector<16x8xf32>
    %c0_47 = arith.constant 0 : index
    %c0_48 = arith.constant 0 : index
    %69 = vector.load %arg7[%c0_47, %c0_48] : memref<16x8xf32, #tpu.memory_space<vmem>>, vector<16x8xf32>
    tpu.vector_store %arg7[%c0_47, %c0_48], %68 {strides = array<i32>} : memref<16x8xf32, #tpu.memory_space<vmem>>, vector<16x8xf32>,
    return
  }
  func.func @transform_0(%arg0: i32) -> (i32, i32) {
    %c0_i32 = arith.constant 0 : i32
    %c0_i32_0 = arith.constant 0 : i32
    return %arg0, %c0_i32 : i32, i32
  }
  func.func @transform_1(%arg0: i32) -> (i32, i32) {
    %c0_i32 = arith.constant 0 : i32
    %c0_i32_0 = arith.constant 0 : i32
    %c0_i32_1 = arith.constant 0 : i32
    return %c0_i32, %c0_i32_0 : i32, i32
  }
  func.func @transform_2(%arg0: i32) -> (i32, i32, i32) {
    %c0_i32 = arith.constant 0 : i32
    %c0_i32_0 = arith.constant 0 : i32
    %c0_i32_1 = arith.constant 0 : i32
    %c0_i32_2 = arith.constant 0 : i32
    return %c0_i32, %c0_i32_0, %c0_i32_1 : i32, i32, i32
  }
  func.func @transform_3(%arg0: i32) -> (i32, i32) {
    %c0_i32 = arith.constant 0 : i32
    %c0_i32_0 = arith.constant 0 : i32
    %c0_i32_1 = arith.constant 0 : i32
    return %c0_i32, %c0_i32_0 : i32, i32
  }
  func.func @transform_4(%arg0: i32) -> (i32, i32) {
    %c0_i32 = arith.constant 0 : i32
    %c0_i32_0 = arith.constant 0 : i32
    %c0_i32_1 = arith.constant 0 : i32
    return %c0_i32, %c0_i32_0 : i32, i32
  }
  func.func @transform_5(%arg0: i32) -> (i32, i32) {
    %c0_i32 = arith.constant 0 : i32
    %c0_i32_0 = arith.constant 0 : i32
    %c0_i32_1 = arith.constant 0 : i32
    return %c0_i32, %c0_i32_0 : i32, i32
  }
  func.func @transform_6(%arg0: i32) -> (i32, i32) {
    %c0_i32 = arith.constant 0 : i32
    %c0_i32_0 = arith.constant 0 : i32
    return %arg0, %c0_i32 : i32, i32
  }
}

</mosaic_0001>

<bundles_post_ra>
// kernel: tpu_custom_call.1
= control target key start
LH: loop header
LB: loop body
LE: loop exit
PB: predicated region body
PF: predicated region fallthrough
CT: control target
= control target key end

     0   :  { %11 = vsyncpa [#allocation3], 0  ;;  %s1305_s21 = smov [#allocation2]   ;;  %s1496_s0 = inlined_call_operand.vmem [shape: f32[16,64], index: 0, kind: input, shape index: {}]   ;;  %s1497_s1 = inlined_call_operand.vmem [shape: bf16[64,128], index: 1, kind: input, shape index: {}]   ;;  %s1498_s2 = inlined_call_operand.hbm [shape: bf16[6,128,128], index: 2, kind: input, shape index: {}]   ;;  %s1499_s3 = inlined_call_operand.vmem [shape: bf16[128,8], index: 3, kind: input, shape index: {}]   ;;  %s1500_s4 = inlined_call_operand.vmem [shape: f32[7,128], index: 4, kind: input, shape index: {}]   ;;  %s1501_s5 = inlined_call_operand.vmem [shape: f32[1,8], index: 5, kind: input, shape index: {}]   ;;  %s1502_s6 = inlined_call_operand.vmem [shape: f32[16,8], index: 6, kind: output, shape index: {}]  }
   0x1   :  { %s21_s22 = sshll.u32 %s1305_s21, 4  ;;  %s22_s22 = int_to_ptr.vmem [resolvable:$true] %s21_s22 }
   0x2   :  { %s1291_s23 = scalar_lea.vmem %s22_s22, 6144  ;;  %p1296_p1 = scmp.lt.s32.totalorder %s22_s22, %s22_s22 }
   0x3   :  { %p1292_p0 = scmp.ne.s32.totalorder %s22_s22, %s1291_s23  ;;  %p1297_p2 = scmp.lt.s32.totalorder %s1291_s23, %s1291_s23 }
   0x5   :  { %p1298_p3 = por %p1297_p2, %p1296_p1 }
   0x7   :  { %p1299_p4 = pnand %p1298_p3, %p1292_p0 }
   0x9   :  { %1302 = shalt.err (!%p1299_p4)
}
   0xa   :  { %s1306_s24 = smov 64   ;;  %s1307_s25 = smov 4  }
   0xb   :  { %27 = dma.hbm_to_vmem [thread:$0]  %s1498_s2, 6144, %s22_s22, [#allocation3], %s1306_s24, %s1306_s24, %s1307_s25  }
   0xc   :  { %1303 = dma.done.wait [#allocation3], 6144  }
   0xd   :  { %1304 = vsyncadd [#allocation3], 4294961152  ;;  %v1308_v0 = vmov 0.0   ;;  %vm1309_vm0 = vmmov 0   ;;  %v1223_v1 = vld [vmem:[%s1497_s1 + $0x18] sm:$0xff]   ;;  %v1224_v2 = vld [vmem:[%s1497_s1 + $0x10] sm:$0xff]  }
   0xe   :  { %1066 = vmatprep.subr.bf16.mxu0 %v1308_v0  ;;  %1074 = vmatprep.mubr.msk.bf16.mxu0 %vm1309_vm0, %v1308_v0  ;;  %v1227_v3 = vld [vmem:[#allocation2 + $0x38] sm:$0xff]   ;;  %v1225_v4 = vld [vmem:[%s1497_s1 + $0x8] sm:$0xff]   ;;  %v1228_v5 = vld [vmem:[#allocation2 + $0x30] sm:$0xff]   ;;  %vm78_vm1 = vcmask 523264   ;;  %vm921_vm2 = vcmask 64512  }
   0xf   :  { %1078 = vmatprep.subr.bf16.mxu1 %v1308_v0  ;;  %1094 = vmatprep.mubr.msk.bf16.mxu1 %vm1309_vm0, %v1308_v0  ;;  %v1226_v6 = vld [vmem:[%s1497_s1] sm:$0xff]   ;;  %v39_v8 = vld [vmem:[%s1496_s0 + $0x8] sm:$0xff]  ;;  %v1231_v12 = vld [vmem:[#allocation2 + $0x18] sm:$0xff]  }
  0x10   :  { %1067 = vmatpush3.bf16.msra.mxu0 %v1223_v1  ;;  %1079 = vmatpush3.bf16.msra.mxu1 %v1227_v3  ;;  %v38_v7 = vld [vmem:[%s1496_s0] sm:$0xff]  ;;  %v1229_v9 = vld [vmem:[#allocation2 + $0x28] sm:$0xff]   ;;  %v1232_v13 = vld [vmem:[#allocation2 + $0x10] sm:$0xff]  }
  0x11   :  { %1068 = vmatprep.subr.bf16.mxu0 %v1308_v0  ;;  %1080 = vmatprep.subr.bf16.mxu1 %v1308_v0  ;;  %v40_v10 = vpack.c.bf16 %v39_v8, %v38_v7  ;;  %v1230_v11 = vld [vmem:[#allocation2 + $0x20] sm:$0xff]   ;;  %v1233_v14 = vld [vmem:[#allocation2 + $0x8] sm:$0xff]   ;;  %v1235_v16 = vld [vmem:[#allocation2 + $0x78] sm:$0xff]  }
  0x12   :  { %v1234_v15 = vld [vmem:[#allocation2] sm:$0xff]   ;;  %v1236_v17 = vld [vmem:[#allocation2 + $0x70] sm:$0xff]   ;;  %v1237_v18 = vld [vmem:[#allocation2 + $0x68] sm:$0xff]  }
  0x13   :  { %v1238_v19 = vld [vmem:[#allocation2 + $0x60] sm:$0xff]   ;;  %v1239_v20 = vld [vmem:[#allocation2 + $0x58] sm:$0xff]   ;;  %v1240_v31 = vld [vmem:[#allocation2 + $0x50] sm:$0xff]  }
  0x14   :  { %1069 = vmatpush3.bf16.msra.mxu0 %v1224_v2  ;;  %1081 = vmatpush3.bf16.msra.mxu1 %v1228_v5  ;;  %v929_v21 = vld [vmem:[%s1500_s4] ss:$0 sm:$0xff]  ;;  %v1241_v32 = vld [vmem:[#allocation2 + $0x48] sm:$0xff]   ;;  %v1243_v34 = vld [vmem:[#allocation2 + $0xb8] sm:$0xff]  }
  0x15   :  { %1070 = vmatprep.subr.bf16.mxu0 %v1308_v0  ;;  %1082 = vmatprep.subr.bf16.mxu1 %v1308_v0  ;;  %v1242_v33 = vld [vmem:[#allocation2 + $0x40] sm:$0xff]   ;;  %v1244_v35 = vld [vmem:[#allocation2 + $0xb0] sm:$0xff]   ;;  %v1245_v36 = vld [vmem:[#allocation2 + $0xa8] sm:$0xff]  }
  0x16   :  { %v1246_v37 = vld [vmem:[#allocation2 + $0xa0] sm:$0xff]   ;;  %v1247_v38 = vld [vmem:[#allocation2 + $0x98] sm:$0xff]   ;;  %v1248_v49 = vld [vmem:[#allocation2 + $0x90] sm:$0xff]  }
  0x17   :  { %v935_v39 = vld [vmem:[%s1500_s4 + $0x1] ss:$0 sm:$0xff]  ;;  %v1249_v50 = vld [vmem:[#allocation2 + $0x88] sm:$0xff]   ;;  %v1251_v52 = vld [vmem:[#allocation2 + $0xf8] sm:$0xff]  }
  0x18   :  { %1071 = vmatpush3.bf16.msra.mxu0 %v1225_v4  ;;  %1083 = vmatpush3.bf16.msra.mxu1 %v1229_v9  ;;  %v1250_v51 = vld [vmem:[#allocation2 + $0x80] sm:$0xff]   ;;  %v1252_v53 = vld [vmem:[#allocation2 + $0xf0] sm:$0xff]   ;;  %v1253_v54 = vld [vmem:[#allocation2 + $0xe8] sm:$0xff]  }
  0x19   :  { %1072 = vmatprep.subr.bf16.mxu0 %v1308_v0  ;;  %1084 = vmatprep.subr.bf16.mxu1 %v1308_v0  ;;  %v1254_v55 = vld [vmem:[#allocation2 + $0xe0] sm:$0xff]   ;;  %v1255_v56 = vld [vmem:[#allocation2 + $0xd8] sm:$0xff]   ;;  %v1256_v4 = vld [vmem:[#allocation2 + $0xd0] sm:$0xff]  }
  0x1a   :  { %v944_v57 = vld [vmem:[%s1500_s4 + $0x2] ss:$0 sm:$0xff]  ;;  %v1257_v5 = vld [vmem:[#allocation2 + $0xc8] sm:$0xff]   ;;  %v1259_v7 = vld [vmem:[#allocation2 + $0x138] sm:$0xff]  }
  0x1b   :  { %v1260_v8 = vld [vmem:[#allocation2 + $0x130] sm:$0xff]   ;;  %v1261_v9 = vld [vmem:[#allocation2 + $0x128] sm:$0xff]  }
  0x1c   :  { %1073 = vmatpush3.bf16.msra.mxu0 %v1226_v6  ;;  %1085 = vmatpush3.bf16.msra.mxu1 %v1230_v11  ;;  %v1258_v6 = vld [vmem:[#allocation2 + $0xc0] sm:$0xff]   ;;  %v1263_v11 = vld [vmem:[#allocation2 + $0x118] sm:$0xff]  }
  0x1d   :  { %1098 = vmatprep.subr.bf16.mxu0 %v1308_v0  ;;  %1086 = vmatprep.subr.bf16.mxu1 %v1308_v0 }
  0x1f   :  { %1075 = vmatmul.mubr.msk.bf16.vlgmr.msra.gmra.mxu0 %vm78_vm1, %v40_v10  ;;  %v1262_v10 = vld [vmem:[#allocation2 + $0x120] sm:$0xff]  }
  0x20   :  { %1114 = vmatprep.mubr.msk.bf16.mxu0 %vm1309_vm0, %v1308_v0  ;;  %1087 = vmatpush3.bf16.msra.mxu1 %v1231_v12  ;;  %v953_v12 = vld [vmem:[%s1500_s4 + $0x3] ss:$0 sm:$0xff] }
  0x21   :  { %1088 = vmatprep.subr.bf16.mxu1 %v1308_v0  ;;  %1099 = vmatpush3.bf16.msra.mxu0 %v1235_v16 }
  0x22   :  { %1100 = vmatprep.subr.bf16.mxu0 %v1308_v0 }
  0x24   :  { %1089 = vmatpush3.bf16.msra.mxu1 %v1232_v13 }
  0x25   :  { %1090 = vmatprep.subr.bf16.mxu1 %v1308_v0  ;;  %1101 = vmatpush3.bf16.msra.mxu0 %v1236_v17 }
  0x26   :  { %1102 = vmatprep.subr.bf16.mxu0 %v1308_v0 }
  0x28   :  { %1091 = vmatpush3.bf16.msra.mxu1 %v1233_v14 }
  0x29   :  { %1092 = vmatprep.subr.bf16.mxu1 %v1308_v0  ;;  %1103 = vmatpush3.bf16.msra.mxu0 %v1237_v18 }
  0x2a   :  { %1104 = vmatprep.subr.bf16.mxu0 %v1308_v0 }
  0x2c   :  { %1093 = vmatpush3.bf16.msra.mxu1 %v1234_v15 }
  0x2d   :  { %1118 = vmatprep.subr.bf16.mxu1 %v1308_v0  ;;  %1105 = vmatpush3.bf16.msra.mxu0 %v1238_v19 }
  0x2e   :  { %1106 = vmatprep.subr.bf16.mxu0 %v1308_v0 }
  0x31   :  { %1107 = vmatpush3.bf16.msra.mxu0 %v1239_v20 }
  0x32   :  { %1108 = vmatprep.subr.bf16.mxu0 %v1308_v0 }
  0x35   :  { %1109 = vmatpush3.bf16.msra.mxu0 %v1240_v31 }
  0x36   :  { %1110 = vmatprep.subr.bf16.mxu0 %v1308_v0 }
  0x39   :  { %1111 = vmatpush3.bf16.msra.mxu0 %v1241_v32 }
  0x3a   :  { %1112 = vmatprep.subr.bf16.mxu0 %v1308_v0 }
  0x3d   :  { %1113 = vmatpush3.bf16.msra.mxu0 %v1242_v33 }
  0x3e   :  { %1138 = vmatprep.subr.bf16.mxu0 %v1308_v0 }
  0xdf   :  { %v116_v22 = vpop.f32.mrf.mxu0 }
  0xe0   :  { %v117_v24 = vadd.f32 %v929_v21, %v116_v22  ;;  %v1264_v22 = vld [vmem:[#allocation2 + $0x110] sm:$0xff]  }
  0xe1   :  { %v1076_v23 = vpop.f32.mrf.mxu0 }
  0xe2   :  { %v123_v28 = vmax.f32 %v117_v24, 0.0  ;;  %v1265_v23 = vld [vmem:[#allocation2 + $0x108] sm:$0xff]   ;;  %v1266_v24 = vld [vmem:[#allocation2 + $0x100] sm:$0xff]  }
  0xe3   :  { %v119_v25 = vpop.f32.mrf.mxu0 }
  0xe4   :  { %v120_v26 = vadd.f32 %v929_v21, %v119_v25  ;;  %v1267_v25 = vld [vmem:[#allocation2 + $0x178] sm:$0xff]  }
  0xe5   :  { %v1077_v27 = vpop.f32.mrf.mxu0 }
  0xe6   :  { %v124_v29 = vmax.f32 %v120_v26, 0.0  ;;  %v1268_v26 = vld [vmem:[#allocation2 + $0x170] sm:$0xff]   ;;  %v1269_v27 = vld [vmem:[#allocation2 + $0x168] sm:$0xff]  }
  0xe8   :  { %v125_v30 = vpack.c.bf16 %v124_v29, %v123_v28  ;;  %v1270_v28 = vld [vmem:[#allocation2 + $0x160] sm:$0xff]   ;;  %v1271_v29 = vld [vmem:[#allocation2 + $0x158] sm:$0xff]  }
  0xea   :  { %1095 = vmatmul.mubr.bf16.vlgmr.msra.gmra.mxu1 %v125_v30  ;;  %v962_v30 = vld [vmem:[%s1500_s4 + $0x4] ss:$0 sm:$0xff] }
  0xeb   :  { %1134 = vmatprep.mubr.msk.bf16.mxu1 %vm1309_vm0, %v1308_v0  ;;  %1119 = vmatpush3.bf16.msra.mxu1 %v1243_v34 }
  0xec   :  { %1120 = vmatprep.subr.bf16.mxu1 %v1308_v0 }
  0xef   :  { %1121 = vmatpush3.bf16.msra.mxu1 %v1244_v35 }
  0xf0   :  { %1122 = vmatprep.subr.bf16.mxu1 %v1308_v0 }
  0xf3   :  { %1123 = vmatpush3.bf16.msra.mxu1 %v1245_v36 }
  0xf4   :  { %1124 = vmatprep.subr.bf16.mxu1 %v1308_v0 }
  0xf7   :  { %1125 = vmatpush3.bf16.msra.mxu1 %v1246_v37 }
  0xf8   :  { %1126 = vmatprep.subr.bf16.mxu1 %v1308_v0 }
  0xfb   :  { %1127 = vmatpush3.bf16.msra.mxu1 %v1247_v38 }
  0xfc   :  { %1128 = vmatprep.subr.bf16.mxu1 %v1308_v0 }
  0xff   :  { %1129 = vmatpush3.bf16.msra.mxu1 %v1248_v49 }
 0x100   :  { %1130 = vmatprep.subr.bf16.mxu1 %v1308_v0 }
 0x103   :  { %1131 = vmatpush3.bf16.msra.mxu1 %v1249_v50 }
 0x104   :  { %1132 = vmatprep.subr.bf16.mxu1 %v1308_v0 }
 0x107   :  { %1133 = vmatpush3.bf16.msra.mxu1 %v1250_v51 }
 0x108   :  { %1158 = vmatprep.subr.bf16.mxu1 %v1308_v0 }
 0x1aa   :  { %v229_v40 = vpop.f32.mrf.mxu1 }
 0x1ab   :  { %v230_v42 = vadd.f32 %v935_v39, %v229_v40  ;;  %v1272_v40 = vld [vmem:[#allocation2 + $0x150] sm:$0xff]  }
 0x1ac   :  { %v1096_v41 = vpop.f32.mrf.mxu1 }
 0x1ad   :  { %v236_v46 = vmax.f32 %v230_v42, 0.0  ;;  %v1273_v41 = vld [vmem:[#allocation2 + $0x148] sm:$0xff]   ;;  %v1274_v42 = vld [vmem:[#allocation2 + $0x140] sm:$0xff]  }
 0x1ae   :  { %v232_v43 = vpop.f32.mrf.mxu1 }
 0x1af   :  { %v233_v44 = vadd.f32 %v935_v39, %v232_v43  ;;  %v1275_v43 = vld [vmem:[%s1499_s3 + $0x38] sm:$0xff]  }
 0x1b0   :  { %v1097_v45 = vpop.f32.mrf.mxu1 }
 0x1b1   :  { %v237_v47 = vmax.f32 %v233_v44, 0.0  ;;  %v1276_v44 = vld [vmem:[%s1499_s3 + $0x30] sm:$0xff]   ;;  %v1277_v45 = vld [vmem:[%s1499_s3 + $0x28] sm:$0xff]  }
 0x1b3   :  { %v238_v48 = vpack.c.bf16 %v237_v47, %v236_v46  ;;  %v1278_v46 = vld [vmem:[%s1499_s3 + $0x20] sm:$0xff]   ;;  %v1279_v47 = vld [vmem:[%s1499_s3 + $0x18] sm:$0xff]  }
 0x1b5   :  { %1115 = vmatmul.mubr.bf16.vlgmr.msra.gmra.mxu0 %v238_v48  ;;  %v971_v48 = vld [vmem:[%s1500_s4 + $0x5] ss:$0 sm:$0xff] }
 0x1b6   :  { %1154 = vmatprep.mubr.msk.bf16.mxu0 %vm1309_vm0, %v1308_v0  ;;  %1139 = vmatpush3.bf16.msra.mxu0 %v1251_v52 }
 0x1b7   :  { %1140 = vmatprep.subr.bf16.mxu0 %v1308_v0 }
 0x1ba   :  { %1141 = vmatpush3.bf16.msra.mxu0 %v1252_v53 }
 0x1bb   :  { %1142 = vmatprep.subr.bf16.mxu0 %v1308_v0 }
 0x1be   :  { %1143 = vmatpush3.bf16.msra.mxu0 %v1253_v54 }
 0x1bf   :  { %1144 = vmatprep.subr.bf16.mxu0 %v1308_v0 }
 0x1c2   :  { %1145 = vmatpush3.bf16.msra.mxu0 %v1254_v55 }
 0x1c3   :  { %1146 = vmatprep.subr.bf16.mxu0 %v1308_v0 }
 0x1c6   :  { %1147 = vmatpush3.bf16.msra.mxu0 %v1255_v56 }
 0x1c7   :  { %1148 = vmatprep.subr.bf16.mxu0 %v1308_v0 }
 0x1ca   :  { %1149 = vmatpush3.bf16.msra.mxu0 %v1256_v4 }
 0x1cb   :  { %1150 = vmatprep.subr.bf16.mxu0 %v1308_v0 }
 0x1ce   :  { %1151 = vmatpush3.bf16.msra.mxu0 %v1257_v5 }
 0x1cf   :  { %1152 = vmatprep.subr.bf16.mxu0 %v1308_v0 }
 0x1d2   :  { %1153 = vmatpush3.bf16.msra.mxu0 %v1258_v6 }
 0x1d3   :  { %1178 = vmatprep.subr.bf16.mxu0 %v1308_v0 }
 0x275   :  { %v343_v58 = vpop.f32.mrf.mxu0 }
 0x276   :  { %v344_v60 = vadd.f32 %v944_v57, %v343_v58  ;;  %v1280_v58 = vld [vmem:[%s1499_s3 + $0x10] sm:$0xff]  }
 0x277   :  { %v1116_v59 = vpop.f32.mrf.mxu0 }
 0x278   :  { %v350_v1 = vmax.f32 %v344_v60, 0.0  ;;  %v1281_v59 = vld [vmem:[%s1499_s3 + $0x8] sm:$0xff]   ;;  %v1282_v60 = vld [vmem:[%s1499_s3] sm:$0xff]  }
 0x279   :  { %v346_v61 = vpop.f32.mrf.mxu0 }
 0x27a   :  { %v347_v62 = vadd.f32 %v944_v57, %v346_v61  ;;  %v980_v61 = vld [vmem:[%s1500_s4 + $0x6] ss:$0 sm:$0xff] }
 0x27b   :  { %v1117_v63 = vpop.f32.mrf.mxu0 }
 0x27c   :  { %v351_v2 = vmax.f32 %v347_v62, 0.0 }
 0x27e   :  { %v352_v3 = vpack.c.bf16 %v351_v2, %v350_v1 }
 0x280   :  { %1135 = vmatmul.mubr.bf16.vlgmr.msra.gmra.mxu1 %v352_v3 }
 0x281   :  { %1174 = vmatprep.mubr.msk.bf16.mxu1 %vm1309_vm0, %v1308_v0  ;;  %1159 = vmatpush3.bf16.msra.mxu1 %v1259_v7 }
 0x282   :  { %1160 = vmatprep.subr.bf16.mxu1 %v1308_v0 }
 0x285   :  { %1161 = vmatpush3.bf16.msra.mxu1 %v1260_v8 }
 0x286   :  { %1162 = vmatprep.subr.bf16.mxu1 %v1308_v0 }
 0x289   :  { %1163 = vmatpush3.bf16.msra.mxu1 %v1261_v9 }
 0x28a   :  { %1164 = vmatprep.subr.bf16.mxu1 %v1308_v0 }
 0x28d   :  { %1165 = vmatpush3.bf16.msra.mxu1 %v1262_v10 }
 0x28e   :  { %1166 = vmatprep.subr.bf16.mxu1 %v1308_v0 }
 0x291   :  { %1167 = vmatpush3.bf16.msra.mxu1 %v1263_v11 }
 0x292   :  { %1168 = vmatprep.subr.bf16.mxu1 %v1308_v0 }
 0x295   :  { %1169 = vmatpush3.bf16.msra.mxu1 %v1264_v22 }
 0x296   :  { %1170 = vmatprep.subr.bf16.mxu1 %v1308_v0 }
 0x299   :  { %1171 = vmatpush3.bf16.msra.mxu1 %v1265_v23 }
 0x29a   :  { %1172 = vmatprep.subr.bf16.mxu1 %v1308_v0 }
 0x29d   :  { %1173 = vmatpush3.bf16.msra.mxu1 %v1266_v24 }
 0x29e   :  { %1198 = vmatprep.subr.bf16.mxu1 %v1308_v0 }
 0x340   :  { %v457_v13 = vpop.f32.mrf.mxu1 }
 0x341   :  { %v458_v15 = vadd.f32 %v953_v12, %v457_v13 }
 0x342   :  { %v1136_v14 = vpop.f32.mrf.mxu1 }
 0x343   :  { %v464_v19 = vmax.f32 %v458_v15, 0.0 }
 0x344   :  { %v460_v16 = vpop.f32.mrf.mxu1 }
 0x345   :  { %v461_v17 = vadd.f32 %v953_v12, %v460_v16 }
 0x346   :  { %v1137_v18 = vpop.f32.mrf.mxu1 }
 0x347   :  { %v465_v20 = vmax.f32 %v461_v17, 0.0 }
 0x349   :  { %v466_v21 = vpack.c.bf16 %v465_v20, %v464_v19 }
 0x34b   :  { %1155 = vmatmul.mubr.bf16.vlgmr.msra.gmra.mxu0 %v466_v21 }
 0x34c   :  { %1194 = vmatprep.mubr.msk.bf16.mxu0 %vm1309_vm0, %v1308_v0  ;;  %1179 = vmatpush3.bf16.msra.mxu0 %v1267_v25 }
 0x34d   :  { %1180 = vmatprep.subr.bf16.mxu0 %v1308_v0 }
 0x350   :  { %1181 = vmatpush3.bf16.msra.mxu0 %v1268_v26 }
 0x351   :  { %1182 = vmatprep.subr.bf16.mxu0 %v1308_v0 }
 0x354   :  { %1183 = vmatpush3.bf16.msra.mxu0 %v1269_v27 }
 0x355   :  { %1184 = vmatprep.subr.bf16.mxu0 %v1308_v0 }
 0x358   :  { %1185 = vmatpush3.bf16.msra.mxu0 %v1270_v28 }
 0x359   :  { %1186 = vmatprep.subr.bf16.mxu0 %v1308_v0 }
 0x35c   :  { %1187 = vmatpush3.bf16.msra.mxu0 %v1271_v29 }
 0x35d   :  { %1188 = vmatprep.subr.bf16.mxu0 %v1308_v0 }
 0x360   :  { %1189 = vmatpush3.bf16.msra.mxu0 %v1272_v40 }
 0x361   :  { %1190 = vmatprep.subr.bf16.mxu0 %v1308_v0 }
 0x364   :  { %1191 = vmatpush3.bf16.msra.mxu0 %v1273_v41 }
 0x365   :  { %1192 = vmatprep.subr.bf16.mxu0 %v1308_v0 }
 0x368   :  { %1193 = vmatpush3.bf16.msra.mxu0 %v1274_v42 }
 0x40b   :  { %v571_v31 = vpop.f32.mrf.mxu0 }
 0x40c   :  { %v572_v33 = vadd.f32 %v962_v30, %v571_v31 }
 0x40d   :  { %v1156_v32 = vpop.f32.mrf.mxu0 }
 0x40e   :  { %v578_v37 = vmax.f32 %v572_v33, 0.0 }
 0x40f   :  { %v574_v34 = vpop.f32.mrf.mxu0 }
 0x410   :  { %v575_v35 = vadd.f32 %v962_v30, %v574_v34 }
 0x411   :  { %v1157_v36 = vpop.f32.mrf.mxu0 }
 0x412   :  { %v579_v38 = vmax.f32 %v575_v35, 0.0 }
 0x414   :  { %v580_v39 = vpack.c.bf16 %v579_v38, %v578_v37 }
 0x416   :  { %1175 = vmatmul.mubr.bf16.vlgmr.msra.gmra.mxu1 %v580_v39 }
 0x417   :  { %1214 = vmatprep.mubr.msk.bf16.mxu1 %vm1309_vm0, %v1308_v0  ;;  %1199 = vmatpush3.bf16.msra.mxu1 %v1275_v43 }
 0x418   :  { %1200 = vmatprep.subr.bf16.mxu1 %v1308_v0 }
 0x41b   :  { %1201 = vmatpush3.bf16.msra.mxu1 %v1276_v44 }
 0x41c   :  { %1202 = vmatprep.subr.bf16.mxu1 %v1308_v0 }
 0x41f   :  { %1203 = vmatpush3.bf16.msra.mxu1 %v1277_v45 }
 0x420   :  { %1204 = vmatprep.subr.bf16.mxu1 %v1308_v0 }
 0x423   :  { %1205 = vmatpush3.bf16.msra.mxu1 %v1278_v46 }
 0x424   :  { %1206 = vmatprep.subr.bf16.mxu1 %v1308_v0 }
 0x427   :  { %1207 = vmatpush3.bf16.msra.mxu1 %v1279_v47 }
 0x428   :  { %1208 = vmatprep.subr.bf16.mxu1 %v1308_v0 }
 0x42b   :  { %1209 = vmatpush3.bf16.msra.mxu1 %v1280_v58 }
 0x42c   :  { %1210 = vmatprep.subr.bf16.mxu1 %v1308_v0 }
 0x42f   :  { %1211 = vmatpush3.bf16.msra.mxu1 %v1281_v59 }
 0x430   :  { %1212 = vmatprep.subr.bf16.mxu1 %v1308_v0  ;;  %v989_v0 = vld [vmem:[%s1501_s5] ss:$0 sm:$0xff] }
 0x433   :  { %1213 = vmatpush3.bf16.msra.mxu1 %v1282_v60 }
 0x4d6   :  { %v685_v49 = vpop.f32.mrf.mxu1 }
 0x4d7   :  { %v686_v51 = vadd.f32 %v971_v48, %v685_v49 }
 0x4d8   :  { %v1176_v50 = vpop.f32.mrf.mxu1 }
 0x4d9   :  { %v692_v55 = vmax.f32 %v686_v51, 0.0 }
 0x4da   :  { %v688_v52 = vpop.f32.mrf.mxu1 }
 0x4db   :  { %v689_v53 = vadd.f32 %v971_v48, %v688_v52 }
 0x4dc   :  { %v1177_v54 = vpop.f32.mrf.mxu1 }
 0x4dd   :  { %v693_v56 = vmax.f32 %v689_v53, 0.0 }
 0x4df   :  { %v694_v57 = vpack.c.bf16 %v693_v56, %v692_v55 }
 0x4e1   :  { %1195 = vmatmul.mubr.bf16.vlgmr.msra.gmra.mxu0 %v694_v57 }
 0x5a1   :  { %v799_v62 = vpop.f32.mrf.mxu0 }
 0x5a2   :  { %v800_v1 = vadd.f32 %v980_v61, %v799_v62 }
 0x5a3   :  { %v1196_v63 = vpop.f32.mrf.mxu0 }
 0x5a4   :  { %v806_v5 = vmax.f32 %v800_v1, 0.0 }
 0x5a5   :  { %v802_v2 = vpop.f32.mrf.mxu0 }
 0x5a6   :  { %v803_v3 = vadd.f32 %v980_v61, %v802_v2 }
 0x5a7   :  { %v1197_v4 = vpop.f32.mrf.mxu0 }
 0x5a8   :  { %v807_v6 = vmax.f32 %v803_v3, 0.0 }
 0x5aa   :  { %v808_v7 = vpack.c.bf16 %v807_v6, %v806_v5 }
 0x5ac   :  { %1215 = vmatmul.mubr.bf16.vlgmr.msra.gmra.mxu1 %v808_v7 }
 0x66c   :  { %v914_v8 = vpop.f32.mrf.mxu1 }
 0x66d   :  { %v915_v9 = vadd.f32 %v989_v0, %v914_v8 }
 0x66e   :  { %v1216_v10 = vpop.f32.mrf.mxu1 }
 0x66f   :  { %922 = vst.msk [vmem:[%s1502_s6] sm:$0xff] %vm921_vm2, %v915_v9 }
 0x670   :  { %v917_v11 = vpop.f32.mrf.mxu1 }
 0x671   :  { %v918_v12 = vadd.f32 %v989_v0, %v917_v11 }
 0x672   :  { %v1217_v13 = vpop.f32.mrf.mxu1 }
 0x673   :  { %923 = vst.msk [vmem:[%s1502_s6 + $0x8] sm:$0xff] %vm921_vm2, %v918_v12 }
 0x674   :  { %928 = vsyncpa [#allocation3], 1 }

</bundles_post_ra>
